<compile_context>
chip_gen: v6e
topology: v6e:2x2x1
jax: 0.10.0
libtpu: 0.0.40
codegen_flags: <defaults>
</compile_context>

<pallas_src>
import jax
import jax.numpy as jnp
from jax.experimental import pallas as pl
from jax.experimental.pallas import tpu as pltpu


def policy_kernel(xf_ref, h0_ref, c0_ref,
                  w1_ref, b1_ref,
                  wih_ref, whh_ref, blstm_ref,
                  w3_ref, b3_ref,
                  probs_ref, hout_ref, cout_ref,
                  hseq_ref):
    # xf_ref: (S*B, D) time-major flattened input (row = t*B + b), f32
    # weights (w1, wih, whh, w3) are bf16; biases/states f32; f32 accumulation.
    SB, D = xf_ref.shape
    B, H = h0_ref.shape
    S = SB // B

    # ---- linear1 + relu on the whole flattened slab (single MXU push) ----
    xp = jnp.dot(xf_ref[...].astype(jnp.bfloat16), w1_ref[...],
                 preferred_element_type=jnp.float32)              # (S*B, H)
    xp = jnp.maximum(xp + b1_ref[...], 0.0)

    # ---- hoisted LSTM input projection for all timesteps (single MXU push) ----
    xg = jnp.dot(xp.astype(jnp.bfloat16), wih_ref[...],
                 preferred_element_type=jnp.float32)              # (S*B, 4H)
    xg = xg + blstm_ref[...]                                      # b_ih + b_hh

    # ---- LSTM recurrence: only h @ W_hh + pointwise per step ----
    h = h0_ref[...]                                               # (B, H) f32
    c = c0_ref[...]                                               # (B, H) f32
    whh = whh_ref[...]                                            # (H, 4H) bf16

    for t in range(S):                                            # small static S: fully unrolled
        gates = xg[t * B:(t + 1) * B, :] + jnp.dot(
            h.astype(jnp.bfloat16), whh,
            preferred_element_type=jnp.float32)                   # (B, 4H)
        # one sigmoid + one tanh over all 4H lanes, slice afterwards
        sg = jax.nn.sigmoid(gates)
        th = jnp.tanh(gates)
        i_g = sg[:, 0 * H:1 * H]
        f_g = sg[:, 1 * H:2 * H]
        g_g = th[:, 2 * H:3 * H]
        o_g = sg[:, 3 * H:4 * H]
        c = f_g * c + i_g * g_g
        h = o_g * jnp.tanh(c)
        hseq_ref[t * B:(t + 1) * B, :] = h                        # static store into scratch

    # ---- linear3 + softmax on the whole (S*B, H) slab (single MXU push) ----
    logits = jnp.dot(hseq_ref[...].astype(jnp.bfloat16), w3_ref[...],
                     preferred_element_type=jnp.float32)          # (S*B, A)
    logits = logits + b3_ref[...]
    m = jnp.max(logits, axis=-1, keepdims=True)
    e = jnp.exp(logits - m)
    inv = pl.reciprocal(jnp.sum(e, axis=-1, keepdims=True), approx=True)
    probs_ref[...] = e * inv
    hout_ref[...] = h
    cout_ref[...] = c


def policy_forward(x, h0, c0, params):
    """x: (B, S, D); h0/c0: (1, B, H) PyTorch LSTM layout. Returns (probs, h, c)."""
    B, S, D = x.shape
    H = h0.shape[-1]
    A = params["w3"].shape[-1]

    # Layout plumbing outside the kernel: time-major flat slab (row = t*B + b).
    xf = jnp.transpose(x, (1, 0, 2)).reshape(S * B, D)
    blstm = params["bih"] + params["bhh"]                         # fold LSTM biases once

    bf16 = jnp.bfloat16
    vmem = pl.BlockSpec(memory_space=pltpu.MemorySpace.VMEM)
    out_shapes = (
        jax.ShapeDtypeStruct((S * B, A), jnp.float32),
        jax.ShapeDtypeStruct((B, H), jnp.float32),
        jax.ShapeDtypeStruct((B, H), jnp.float32),
    )
    probs_flat, h, c = pl.pallas_call(
        policy_kernel,
        out_shape=out_shapes,
        in_specs=[vmem] * 10,
        out_specs=(vmem, vmem, vmem),
        scratch_shapes=[pltpu.VMEM((S * B, H), jnp.float32)],
    )(xf, h0[0], c0[0],
      params["w1"].astype(bf16), params["b1"],
      params["wih"].astype(bf16), params["whh"].astype(bf16), blstm,
      params["w3"].astype(bf16), params["b3"])

    # TODO(synk): if B ever grows, add a batch grid axis with dimension_semantics=("parallel",)
    # so v7x's second TensorCore is used; at B=2 a single grid-less call is optimal.
    probs = jnp.transpose(probs_flat.reshape(S, B, A), (1, 0, 2))
    return probs, h[None], c[None]


def policy_reference(x, h0, c0, params):
    """Pure-JAX f32 reference matching torch semantics (for correctness check)."""
    B, S, D = x.shape
    H = h0.shape[-1]
    xp = jnp.maximum(jnp.einsum("bsd,dh->bsh", x, params["w1"]) + params["b1"], 0.0)
    h, c = h0[0], c0[0]
    blstm = params["bih"] + params["bhh"]
    hs = []
    for t in range(S):
        gates = xp[:, t, :] @ params["wih"] + h @ params["whh"] + blstm
        i_g = jax.nn.sigmoid(gates[:, 0 * H:1 * H])
        f_g = jax.nn.sigmoid(gates[:, 1 * H:2 * H])
        g_g = jnp.tanh(gates[:, 2 * H:3 * H])
        o_g = jax.nn.sigmoid(gates[:, 3 * H:4 * H])
        c = f_g * c + i_g * g_g
        h = o_g * jnp.tanh(c)
        hs.append(h)
    hseq = jnp.stack(hs, axis=1)                                   # (B, S, H)
    probs = jax.nn.softmax(hseq @ params["w3"] + params["b3"], axis=2)
    return probs, h[None], c[None]


def _xavier_uniform(key, shape, fan_in, fan_out):
    bound = (6.0 / (fan_in + fan_out)) ** 0.5
    return jax.random.uniform(key, shape, jnp.float32, -bound, bound)


if __name__ == "__main__":
    key = jax.random.PRNGKey(0)
    B, S = 2, 8
    state_space, hidden_space, action_space = 4, 32, 4
    H = hidden_space

    ks = jax.random.split(key, 8)
    lstm_scale = (1.0 / H) ** 0.5  # PyTorch LSTM default init range scale
    params = dict(
        w1=_xavier_uniform(ks[0], (state_space, H), state_space, H),
        b1=jnp.zeros((1, H), jnp.float32),
        wih=lstm_scale * jax.random.normal(ks[1], (H, 4 * H), jnp.float32),
        whh=lstm_scale * jax.random.normal(ks[2], (H, 4 * H), jnp.float32),
        bih=lstm_scale * jax.random.normal(ks[3], (1, 4 * H), jnp.float32),
        bhh=lstm_scale * jax.random.normal(ks[4], (1, 4 * H), jnp.float32),
        w3=_xavier_uniform(ks[5], (H, action_space), H, action_space),
        b3=jnp.zeros((1, action_space), jnp.float32),
    )

    x = jax.random.normal(ks[6], (B, S, state_space), jnp.float32)
    h0 = jnp.zeros((1, B, H), jnp.float32)   # Policy.init_hidden_state analogue
    c0 = jnp.zeros((1, B, H), jnp.float32)

    probs, h, c = policy_forward(x, h0, c0, params)
    jax.block_until_ready((probs, h, c))

    assert probs.shape == (B, S, action_space)
    assert h.shape == (1, B, H) and c.shape == (1, B, H)

    # softmax rows must sum to ~1 (approx reciprocal -> loose tolerance)
    row_sums = jnp.sum(probs, axis=-1)
    assert bool(jnp.all(jnp.abs(row_sums - 1.0) < 5e-3))

    # pure-JAX f32 reference check (bf16 MXU inputs + approx reciprocal -> loose tol)
    probs_ref, h_ref, c_ref = policy_reference(x, h0, c0, params)
    assert bool(jnp.max(jnp.abs(probs - probs_ref)) < 3e-2)
    assert bool(jnp.max(jnp.abs(h - h_ref)) < 3e-2)
    assert bool(jnp.max(jnp.abs(c - c_ref)) < 3e-2)

    print("KERNEL_OK")
</pallas_src>

<mosaic_0001>
module attributes {stable_mosaic.version = 11 : i64} {
  func.func @policy_kernel(%arg0: memref<16x4xf32, #tpu.memory_space<vmem>>, %arg1: memref<2x32xf32, #tpu.memory_space<vmem>>, %arg2: memref<2x32xf32, #tpu.memory_space<vmem>>, %arg3: memref<4x32xbf16, #tpu.memory_space<vmem>>, %arg4: memref<1x32xf32, #tpu.memory_space<vmem>>, %arg5: memref<32x128xbf16, #tpu.memory_space<vmem>>, %arg6: memref<32x128xbf16, #tpu.memory_space<vmem>>, %arg7: memref<1x128xf32, #tpu.memory_space<vmem>>, %arg8: memref<32x4xbf16, #tpu.memory_space<vmem>>, %arg9: memref<1x4xf32, #tpu.memory_space<vmem>>, %arg10: memref<16x4xf32, #tpu.memory_space<vmem>>, %arg11: memref<2x32xf32, #tpu.memory_space<vmem>>, %arg12: memref<2x32xf32, #tpu.memory_space<vmem>>, %arg13: memref<16x32xf32, #tpu.memory_space<vmem>>) attributes {dimension_semantics = [], scalar_prefetch = 0 : i64, scratch_operands = 1 : i64, tpu.core_type = #tpu.core_type<tc>} {
    %c0 = arith.constant 0 : index
    %c0_0 = arith.constant 0 : index
    %0 = vector.load %arg0[%c0, %c0_0] : memref<16x4xf32, #tpu.memory_space<vmem>>, vector<16x4xf32>
    %1 = arith.truncf %0 : vector<16x4xf32> to vector<16x4xbf16>
    %c0_1 = arith.constant 0 : index
    %c0_2 = arith.constant 0 : index
    %2 = vector.load %arg3[%c0_1, %c0_2] : memref<4x32xbf16, #tpu.memory_space<vmem>>, vector<4x32xbf16>
    %cst = arith.constant dense<0.000000e+00> : vector<16x32xf32>
    %3 = tpu.matmul %1, %2, %cst {dimension_numbers = #tpu.dot_dimension_numbers<[1], [0], [0], [1], [0, 0, 1, 1], [], []>} : vector<16x4xbf16>, vector<4x32xbf16>, vector<16x32xf32> -> vector<16x32xf32>
    %c0_3 = arith.constant 0 : index
    %c0_4 = arith.constant 0 : index
    %4 = vector.load %arg4[%c0_3, %c0_4] : memref<1x32xf32, #tpu.memory_space<vmem>>, vector<1x32xf32>
    %5 = vector.broadcast %4 : vector<1x32xf32> to vector<16x32xf32>
    %6 = arith.addf %3, %5 : vector<16x32xf32>
    %cst_5 = arith.constant 0.000000e+00 : f32
    %7 = vector.broadcast %cst_5 : f32 to vector<16x32xf32>
    %8 = arith.maximumf %6, %7 : vector<16x32xf32>
    %9 = arith.truncf %8 : vector<16x32xf32> to vector<16x32xbf16>
    %c0_6 = arith.constant 0 : index
    %c0_7 = arith.constant 0 : index
    %10 = vector.load %arg5[%c0_6, %c0_7] : memref<32x128xbf16, #tpu.memory_space<vmem>>, vector<32x128xbf16>
    %cst_8 = arith.constant dense<0.000000e+00> : vector<16x128xf32>
    %11 = tpu.matmul %9, %10, %cst_8 {dimension_numbers = #tpu.dot_dimension_numbers<[1], [0], [0], [1], [0, 0, 1, 1], [], []>} : vector<16x32xbf16>, vector<32x128xbf16>, vector<16x128xf32> -> vector<16x128xf32>
    %c0_9 = arith.constant 0 : index
    %c0_10 = arith.constant 0 : index
    %12 = vector.load %arg7[%c0_9, %c0_10] : memref<1x128xf32, #tpu.memory_space<vmem>>, vector<1x128xf32>
    %13 = vector.broadcast %12 : vector<1x128xf32> to vector<16x128xf32>
    %14 = arith.addf %11, %13 : vector<16x128xf32>
    %c0_11 = arith.constant 0 : index
    %c0_12 = arith.constant 0 : index
    %15 = vector.load %arg1[%c0_11, %c0_12] : memref<2x32xf32, #tpu.memory_space<vmem>>, vector<2x32xf32>
    %c0_13 = arith.constant 0 : index
    %c0_14 = arith.constant 0 : index
    %16 = vector.load %arg2[%c0_13, %c0_14] : memref<2x32xf32, #tpu.memory_space<vmem>>, vector<2x32xf32>
    %c0_15 = arith.constant 0 : index
    %c0_16 = arith.constant 0 : index
    %17 = vector.load %arg6[%c0_15, %c0_16] : memref<32x128xbf16, #tpu.memory_space<vmem>>, vector<32x128xbf16>
    %18 = vector.extract_strided_slice %14 {offsets = [0, 0], sizes = [2, 128], strides = [1, 1]} : vector<16x128xf32> to vector<2x128xf32>
    %19 = arith.truncf %15 : vector<2x32xf32> to vector<2x32xbf16>
    %cst_17 = arith.constant dense<0.000000e+00> : vector<2x128xf32>
    %20 = tpu.matmul %19, %17, %cst_17 {dimension_numbers = #tpu.dot_dimension_numbers<[1], [0], [0], [1], [0, 0, 1, 1], [], []>} : vector<2x32xbf16>, vector<32x128xbf16>, vector<2x128xf32> -> vector<2x128xf32>
    %21 = arith.addf %18, %20 : vector<2x128xf32>
    %22 = arith.negf %21 : vector<2x128xf32>
    %23 = math.exp %22 : vector<2x128xf32>
    %cst_18 = arith.constant 1.000000e+00 : f32
    %24 = vector.broadcast %cst_18 : f32 to vector<2x128xf32>
    %25 = arith.addf %24, %23 : vector<2x128xf32>
    %26 = arith.divf %24, %25 : vector<2x128xf32>
    %27 = math.tanh %21 : vector<2x128xf32>
    %28 = vector.extract_strided_slice %26 {offsets = [0, 0], sizes = [2, 32], strides = [1, 1]} : vector<2x128xf32> to vector<2x32xf32>
    %29 = vector.extract_strided_slice %26 {offsets = [0, 32], sizes = [2, 32], strides = [1, 1]} : vector<2x128xf32> to vector<2x32xf32>
    %30 = vector.extract_strided_slice %27 {offsets = [0, 64], sizes = [2, 32], strides = [1, 1]} : vector<2x128xf32> to vector<2x32xf32>
    %31 = vector.extract_strided_slice %26 {offsets = [0, 96], sizes = [2, 32], strides = [1, 1]} : vector<2x128xf32> to vector<2x32xf32>
    %32 = arith.mulf %29, %16 : vector<2x32xf32>
    %33 = arith.mulf %28, %30 : vector<2x32xf32>
    %34 = arith.addf %32, %33 : vector<2x32xf32>
    %35 = math.tanh %34 : vector<2x32xf32>
    %36 = arith.mulf %31, %35 : vector<2x32xf32>
    %c0_19 = arith.constant 0 : index
    %c0_20 = arith.constant 0 : index
    %37 = vector.load %arg13[%c0_19, %c0_20] : memref<16x32xf32, #tpu.memory_space<vmem>>, vector<2x32xf32>
    tpu.vector_store %arg13[%c0_19, %c0_20], %36 {strides = array<i32>} : memref<16x32xf32, #tpu.memory_space<vmem>>, vector<2x32xf32>,
    %38 = vector.extract_strided_slice %14 {offsets = [2, 0], sizes = [2, 128], strides = [1, 1]} : vector<16x128xf32> to vector<2x128xf32>
    %39 = arith.truncf %36 : vector<2x32xf32> to vector<2x32xbf16>
    %cst_21 = arith.constant dense<0.000000e+00> : vector<2x128xf32>
    %40 = tpu.matmul %39, %17, %cst_21 {dimension_numbers = #tpu.dot_dimension_numbers<[1], [0], [0], [1], [0, 0, 1, 1], [], []>} : vector<2x32xbf16>, vector<32x128xbf16>, vector<2x128xf32> -> vector<2x128xf32>
    %41 = arith.addf %38, %40 : vector<2x128xf32>
    %42 = arith.negf %41 : vector<2x128xf32>
    %43 = math.exp %42 : vector<2x128xf32>
    %cst_22 = arith.constant 1.000000e+00 : f32
    %44 = vector.broadcast %cst_22 : f32 to vector<2x128xf32>
    %45 = arith.addf %44, %43 : vector<2x128xf32>
    %46 = arith.divf %44, %45 : vector<2x128xf32>
    %47 = math.tanh %41 : vector<2x128xf32>
    %48 = vector.extract_strided_slice %46 {offsets = [0, 0], sizes = [2, 32], strides = [1, 1]} : vector<2x128xf32> to vector<2x32xf32>
    %49 = vector.extract_strided_slice %46 {offsets = [0, 32], sizes = [2, 32], strides = [1, 1]} : vector<2x128xf32> to vector<2x32xf32>
    %50 = vector.extract_strided_slice %47 {offsets = [0, 64], sizes = [2, 32], strides = [1, 1]} : vector<2x128xf32> to vector<2x32xf32>
    %51 = vector.extract_strided_slice %46 {offsets = [0, 96], sizes = [2, 32], strides = [1, 1]} : vector<2x128xf32> to vector<2x32xf32>
    %52 = arith.mulf %49, %34 : vector<2x32xf32>
    %53 = arith.mulf %48, %50 : vector<2x32xf32>
    %54 = arith.addf %52, %53 : vector<2x32xf32>
    %55 = math.tanh %54 : vector<2x32xf32>
    %56 = arith.mulf %51, %55 : vector<2x32xf32>
    %c2 = arith.constant 2 : index
    %c0_23 = arith.constant 0 : index
    %57 = vector.load %arg13[%c2, %c0_23] : memref<16x32xf32, #tpu.memory_space<vmem>>, vector<2x32xf32>
    tpu.vector_store %arg13[%c2, %c0_23], %56 {strides = array<i32>} : memref<16x32xf32, #tpu.memory_space<vmem>>, vector<2x32xf32>,
    %58 = vector.extract_strided_slice %14 {offsets = [4, 0], sizes = [2, 128], strides = [1, 1]} : vector<16x128xf32> to vector<2x128xf32>
    %59 = arith.truncf %56 : vector<2x32xf32> to vector<2x32xbf16>
    %cst_24 = arith.constant dense<0.000000e+00> : vector<2x128xf32>
    %60 = tpu.matmul %59, %17, %cst_24 {dimension_numbers = #tpu.dot_dimension_numbers<[1], [0], [0], [1], [0, 0, 1, 1], [], []>} : vector<2x32xbf16>, vector<32x128xbf16>, vector<2x128xf32> -> vector<2x128xf32>
    %61 = arith.addf %58, %60 : vector<2x128xf32>
    %62 = arith.negf %61 : vector<2x128xf32>
    %63 = math.exp %62 : vector<2x128xf32>
    %cst_25 = arith.constant 1.000000e+00 : f32
    %64 = vector.broadcast %cst_25 : f32 to vector<2x128xf32>
    %65 = arith.addf %64, %63 : vector<2x128xf32>
    %66 = arith.divf %64, %65 : vector<2x128xf32>
    %67 = math.tanh %61 : vector<2x128xf32>
    %68 = vector.extract_strided_slice %66 {offsets = [0, 0], sizes = [2, 32], strides = [1, 1]} : vector<2x128xf32> to vector<2x32xf32>
    %69 = vector.extract_strided_slice %66 {offsets = [0, 32], sizes = [2, 32], strides = [1, 1]} : vector<2x128xf32> to vector<2x32xf32>
    %70 = vector.extract_strided_slice %67 {offsets = [0, 64], sizes = [2, 32], strides = [1, 1]} : vector<2x128xf32> to vector<2x32xf32>
    %71 = vector.extract_strided_slice %66 {offsets = [0, 96], sizes = [2, 32], strides = [1, 1]} : vector<2x128xf32> to vector<2x32xf32>
    %72 = arith.mulf %69, %54 : vector<2x32xf32>
    %73 = arith.mulf %68, %70 : vector<2x32xf32>
    %74 = arith.addf %72, %73 : vector<2x32xf32>
    %75 = math.tanh %74 : vector<2x32xf32>
    %76 = arith.mulf %71, %75 : vector<2x32xf32>
    %c4 = arith.constant 4 : index
    %c0_26 = arith.constant 0 : index
    %77 = vector.load %arg13[%c4, %c0_26] : memref<16x32xf32, #tpu.memory_space<vmem>>, vector<2x32xf32>
    tpu.vector_store %arg13[%c4, %c0_26], %76 {strides = array<i32>} : memref<16x32xf32, #tpu.memory_space<vmem>>, vector<2x32xf32>,
    %78 = vector.extract_strided_slice %14 {offsets = [6, 0], sizes = [2, 128], strides = [1, 1]} : vector<16x128xf32> to vector<2x128xf32>
    %79 = arith.truncf %76 : vector<2x32xf32> to vector<2x32xbf16>
    %cst_27 = arith.constant dense<0.000000e+00> : vector<2x128xf32>
    %80 = tpu.matmul %79, %17, %cst_27 {dimension_numbers = #tpu.dot_dimension_numbers<[1], [0], [0], [1], [0, 0, 1, 1], [], []>} : vector<2x32xbf16>, vector<32x128xbf16>, vector<2x128xf32> -> vector<2x128xf32>
    %81 = arith.addf %78, %80 : vector<2x128xf32>
    %82 = arith.negf %81 : vector<2x128xf32>
    %83 = math.exp %82 : vector<2x128xf32>
    %cst_28 = arith.constant 1.000000e+00 : f32
    %84 = vector.broadcast %cst_28 : f32 to vector<2x128xf32>
    %85 = arith.addf %84, %83 : vector<2x128xf32>
    %86 = arith.divf %84, %85 : vector<2x128xf32>
    %87 = math.tanh %81 : vector<2x128xf32>
    %88 = vector.extract_strided_slice %86 {offsets = [0, 0], sizes = [2, 32], strides = [1, 1]} : vector<2x128xf32> to vector<2x32xf32>
    %89 = vector.extract_strided_slice %86 {offsets = [0, 32], sizes = [2, 32], strides = [1, 1]} : vector<2x128xf32> to vector<2x32xf32>
    %90 = vector.extract_strided_slice %87 {offsets = [0, 64], sizes = [2, 32], strides = [1, 1]} : vector<2x128xf32> to vector<2x32xf32>
    %91 = vector.extract_strided_slice %86 {offsets = [0, 96], sizes = [2, 32], strides = [1, 1]} : vector<2x128xf32> to vector<2x32xf32>
    %92 = arith.mulf %89, %74 : vector<2x32xf32>
    %93 = arith.mulf %88, %90 : vector<2x32xf32>
    %94 = arith.addf %92, %93 : vector<2x32xf32>
    %95 = math.tanh %94 : vector<2x32xf32>
    %96 = arith.mulf %91, %95 : vector<2x32xf32>
    %c6 = arith.constant 6 : index
    %c0_29 = arith.constant 0 : index
    %97 = vector.load %arg13[%c6, %c0_29] : memref<16x32xf32, #tpu.memory_space<vmem>>, vector<2x32xf32>
    tpu.vector_store %arg13[%c6, %c0_29], %96 {strides = array<i32>} : memref<16x32xf32, #tpu.memory_space<vmem>>, vector<2x32xf32>,
    %98 = vector.extract_strided_slice %14 {offsets = [8, 0], sizes = [2, 128], strides = [1, 1]} : vector<16x128xf32> to vector<2x128xf32>
    %99 = arith.truncf %96 : vector<2x32xf32> to vector<2x32xbf16>
    %cst_30 = arith.constant dense<0.000000e+00> : vector<2x128xf32>
    %100 = tpu.matmul %99, %17, %cst_30 {dimension_numbers = #tpu.dot_dimension_numbers<[1], [0], [0], [1], [0, 0, 1, 1], [], []>} : vector<2x32xbf16>, vector<32x128xbf16>, vector<2x128xf32> -> vector<2x128xf32>
    %101 = arith.addf %98, %100 : vector<2x128xf32>
    %102 = arith.negf %101 : vector<2x128xf32>
    %103 = math.exp %102 : vector<2x128xf32>
    %cst_31 = arith.constant 1.000000e+00 : f32
    %104 = vector.broadcast %cst_31 : f32 to vector<2x128xf32>
    %105 = arith.addf %104, %103 : vector<2x128xf32>
    %106 = arith.divf %104, %105 : vector<2x128xf32>
    %107 = math.tanh %101 : vector<2x128xf32>
    %108 = vector.extract_strided_slice %106 {offsets = [0, 0], sizes = [2, 32], strides = [1, 1]} : vector<2x128xf32> to vector<2x32xf32>
    %109 = vector.extract_strided_slice %106 {offsets = [0, 32], sizes = [2, 32], strides = [1, 1]} : vector<2x128xf32> to vector<2x32xf32>
    %110 = vector.extract_strided_slice %107 {offsets = [0, 64], sizes = [2, 32], strides = [1, 1]} : vector<2x128xf32> to vector<2x32xf32>
    %111 = vector.extract_strided_slice %106 {offsets = [0, 96], sizes = [2, 32], strides = [1, 1]} : vector<2x128xf32> to vector<2x32xf32>
    %112 = arith.mulf %109, %94 : vector<2x32xf32>
    %113 = arith.mulf %108, %110 : vector<2x32xf32>
    %114 = arith.addf %112, %113 : vector<2x32xf32>
    %115 = math.tanh %114 : vector<2x32xf32>
    %116 = arith.mulf %111, %115 : vector<2x32xf32>
    %c8 = arith.constant 8 : index
    %c0_32 = arith.constant 0 : index
    %117 = vector.load %arg13[%c8, %c0_32] : memref<16x32xf32, #tpu.memory_space<vmem>>, vector<2x32xf32>
    tpu.vector_store %arg13[%c8, %c0_32], %116 {strides = array<i32>} : memref<16x32xf32, #tpu.memory_space<vmem>>, vector<2x32xf32>,
    %118 = vector.extract_strided_slice %14 {offsets = [10, 0], sizes = [2, 128], strides = [1, 1]} : vector<16x128xf32> to vector<2x128xf32>
    %119 = arith.truncf %116 : vector<2x32xf32> to vector<2x32xbf16>
    %cst_33 = arith.constant dense<0.000000e+00> : vector<2x128xf32>
    %120 = tpu.matmul %119, %17, %cst_33 {dimension_numbers = #tpu.dot_dimension_numbers<[1], [0], [0], [1], [0, 0, 1, 1], [], []>} : vector<2x32xbf16>, vector<32x128xbf16>, vector<2x128xf32> -> vector<2x128xf32>
    %121 = arith.addf %118, %120 : vector<2x128xf32>
    %122 = arith.negf %121 : vector<2x128xf32>
    %123 = math.exp %122 : vector<2x128xf32>
    %cst_34 = arith.constant 1.000000e+00 : f32
    %124 = vector.broadcast %cst_34 : f32 to vector<2x128xf32>
    %125 = arith.addf %124, %123 : vector<2x128xf32>
    %126 = arith.divf %124, %125 : vector<2x128xf32>
    %127 = math.tanh %121 : vector<2x128xf32>
    %128 = vector.extract_strided_slice %126 {offsets = [0, 0], sizes = [2, 32], strides = [1, 1]} : vector<2x128xf32> to vector<2x32xf32>
    %129 = vector.extract_strided_slice %126 {offsets = [0, 32], sizes = [2, 32], strides = [1, 1]} : vector<2x128xf32> to vector<2x32xf32>
    %130 = vector.extract_strided_slice %127 {offsets = [0, 64], sizes = [2, 32], strides = [1, 1]} : vector<2x128xf32> to vector<2x32xf32>
    %131 = vector.extract_strided_slice %126 {offsets = [0, 96], sizes = [2, 32], strides = [1, 1]} : vector<2x128xf32> to vector<2x32xf32>
    %132 = arith.mulf %129, %114 : vector<2x32xf32>
    %133 = arith.mulf %128, %130 : vector<2x32xf32>
    %134 = arith.addf %132, %133 : vector<2x32xf32>
    %135 = math.tanh %134 : vector<2x32xf32>
    %136 = arith.mulf %131, %135 : vector<2x32xf32>
    %c10 = arith.constant 10 : index
    %c0_35 = arith.constant 0 : index
    %137 = vector.load %arg13[%c10, %c0_35] : memref<16x32xf32, #tpu.memory_space<vmem>>, vector<2x32xf32>
    tpu.vector_store %arg13[%c10, %c0_35], %136 {strides = array<i32>} : memref<16x32xf32, #tpu.memory_space<vmem>>, vector<2x32xf32>,
    %138 = vector.extract_strided_slice %14 {offsets = [12, 0], sizes = [2, 128], strides = [1, 1]} : vector<16x128xf32> to vector<2x128xf32>
    %139 = arith.truncf %136 : vector<2x32xf32> to vector<2x32xbf16>
    %cst_36 = arith.constant dense<0.000000e+00> : vector<2x128xf32>
    %140 = tpu.matmul %139, %17, %cst_36 {dimension_numbers = #tpu.dot_dimension_numbers<[1], [0], [0], [1], [0, 0, 1, 1], [], []>} : vector<2x32xbf16>, vector<32x128xbf16>, vector<2x128xf32> -> vector<2x128xf32>
    %141 = arith.addf %138, %140 : vector<2x128xf32>
    %142 = arith.negf %141 : vector<2x128xf32>
    %143 = math.exp %142 : vector<2x128xf32>
    %cst_37 = arith.constant 1.000000e+00 : f32
    %144 = vector.broadcast %cst_37 : f32 to vector<2x128xf32>
    %145 = arith.addf %144, %143 : vector<2x128xf32>
    %146 = arith.divf %144, %145 : vector<2x128xf32>
    %147 = math.tanh %141 : vector<2x128xf32>
    %148 = vector.extract_strided_slice %146 {offsets = [0, 0], sizes = [2, 32], strides = [1, 1]} : vector<2x128xf32> to vector<2x32xf32>
    %149 = vector.extract_strided_slice %146 {offsets = [0, 32], sizes = [2, 32], strides = [1, 1]} : vector<2x128xf32> to vector<2x32xf32>
    %150 = vector.extract_strided_slice %147 {offsets = [0, 64], sizes = [2, 32], strides = [1, 1]} : vector<2x128xf32> to vector<2x32xf32>
    %151 = vector.extract_strided_slice %146 {offsets = [0, 96], sizes = [2, 32], strides = [1, 1]} : vector<2x128xf32> to vector<2x32xf32>
    %152 = arith.mulf %149, %134 : vector<2x32xf32>
    %153 = arith.mulf %148, %150 : vector<2x32xf32>
    %154 = arith.addf %152, %153 : vector<2x32xf32>
    %155 = math.tanh %154 : vector<2x32xf32>
    %156 = arith.mulf %151, %155 : vector<2x32xf32>
    %c12 = arith.constant 12 : index
    %c0_38 = arith.constant 0 : index
    %157 = vector.load %arg13[%c12, %c0_38] : memref<16x32xf32, #tpu.memory_space<vmem>>, vector<2x32xf32>
    tpu.vector_store %arg13[%c12, %c0_38], %156 {strides = array<i32>} : memref<16x32xf32, #tpu.memory_space<vmem>>, vector<2x32xf32>,
    %158 = vector.extract_strided_slice %14 {offsets = [14, 0], sizes = [2, 128], strides = [1, 1]} : vector<16x128xf32> to vector<2x128xf32>
    %159 = arith.truncf %156 : vector<2x32xf32> to vector<2x32xbf16>
    %cst_39 = arith.constant dense<0.000000e+00> : vector<2x128xf32>
    %160 = tpu.matmul %159, %17, %cst_39 {dimension_numbers = #tpu.dot_dimension_numbers<[1], [0], [0], [1], [0, 0, 1, 1], [], []>} : vector<2x32xbf16>, vector<32x128xbf16>, vector<2x128xf32> -> vector<2x128xf32>
    %161 = arith.addf %158, %160 : vector<2x128xf32>
    %162 = arith.negf %161 : vector<2x128xf32>
    %163 = math.exp %162 : vector<2x128xf32>
    %cst_40 = arith.constant 1.000000e+00 : f32
    %164 = vector.broadcast %cst_40 : f32 to vector<2x128xf32>
    %165 = arith.addf %164, %163 : vector<2x128xf32>
    %166 = arith.divf %164, %165 : vector<2x128xf32>
    %167 = math.tanh %161 : vector<2x128xf32>
    %168 = vector.extract_strided_slice %166 {offsets = [0, 0], sizes = [2, 32], strides = [1, 1]} : vector<2x128xf32> to vector<2x32xf32>
    %169 = vector.extract_strided_slice %166 {offsets = [0, 32], sizes = [2, 32], strides = [1, 1]} : vector<2x128xf32> to vector<2x32xf32>
    %170 = vector.extract_strided_slice %167 {offsets = [0, 64], sizes = [2, 32], strides = [1, 1]} : vector<2x128xf32> to vector<2x32xf32>
    %171 = vector.extract_strided_slice %166 {offsets = [0, 96], sizes = [2, 32], strides = [1, 1]} : vector<2x128xf32> to vector<2x32xf32>
    %172 = arith.mulf %169, %154 : vector<2x32xf32>
    %173 = arith.mulf %168, %170 : vector<2x32xf32>
    %174 = arith.addf %172, %173 : vector<2x32xf32>
    %175 = math.tanh %174 : vector<2x32xf32>
    %176 = arith.mulf %171, %175 : vector<2x32xf32>
    %c14 = arith.constant 14 : index
    %c0_41 = arith.constant 0 : index
    %177 = vector.load %arg13[%c14, %c0_41] : memref<16x32xf32, #tpu.memory_space<vmem>>, vector<2x32xf32>
    tpu.vector_store %arg13[%c14, %c0_41], %176 {strides = array<i32>} : memref<16x32xf32, #tpu.memory_space<vmem>>, vector<2x32xf32>,
    %c0_42 = arith.constant 0 : index
    %c0_43 = arith.constant 0 : index
    %178 = vector.load %arg13[%c0_42, %c0_43] : memref<16x32xf32, #tpu.memory_space<vmem>>, vector<16x32xf32>
    %179 = arith.truncf %178 : vector<16x32xf32> to vector<16x32xbf16>
    %c0_44 = arith.constant 0 : index
    %c0_45 = arith.constant 0 : index
    %180 = vector.load %arg8[%c0_44, %c0_45] : memref<32x4xbf16, #tpu.memory_space<vmem>>, vector<32x4xbf16>
    %cst_46 = arith.constant dense<0.000000e+00> : vector<16x4xf32>
    %181 = tpu.matmul %179, %180, %cst_46 {dimension_numbers = #tpu.dot_dimension_numbers<[1], [0], [0], [1], [0, 0, 1, 1], [], []>} : vector<16x32xbf16>, vector<32x4xbf16>, vector<16x4xf32> -> vector<16x4xf32>
    %c0_47 = arith.constant 0 : index
    %c0_48 = arith.constant 0 : index
    %182 = vector.load %arg9[%c0_47, %c0_48] : memref<1x4xf32, #tpu.memory_space<vmem>>, vector<1x4xf32>
    %183 = vector.broadcast %182 : vector<1x4xf32> to vector<16x4xf32>
    %184 = arith.addf %181, %183 : vector<16x4xf32>
    %cst_49 = arith.constant dense<0xFF800000> : vector<16xf32>
    %185 = vector.multi_reduction <maximumf>, %184, %cst_49 [1] : vector<16x4xf32> to vector<16xf32>
    %186 = vector.shape_cast %185 : vector<16xf32> to vector<16x1xf32>
    %187 = vector.broadcast %186 : vector<16x1xf32> to vector<16x4xf32>
    %188 = arith.subf %184, %187 : vector<16x4xf32>
    %189 = math.exp %188 : vector<16x4xf32>
    %cst_50 = arith.constant dense<0.000000e+00> : vector<16xf32>
    %190 = vector.multi_reduction <add>, %189, %cst_50 [1] : vector<16x4xf32> to vector<16xf32>
    %191 = vector.shape_cast %190 : vector<16xf32> to vector<16x1xf32>
    %192 = tpu.reciprocal %191 {approx = true} : vector<16x1xf32> -> vector<16x1xf32>
    %193 = vector.broadcast %192 : vector<16x1xf32> to vector<16x4xf32>
    %194 = arith.mulf %189, %193 : vector<16x4xf32>
    %c0_51 = arith.constant 0 : index
    %c0_52 = arith.constant 0 : index
    %195 = vector.load %arg10[%c0_51, %c0_52] : memref<16x4xf32, #tpu.memory_space<vmem>>, vector<16x4xf32>
    tpu.vector_store %arg10[%c0_51, %c0_52], %194 {strides = array<i32>} : memref<16x4xf32, #tpu.memory_space<vmem>>, vector<16x4xf32>,
    %c0_53 = arith.constant 0 : index
    %c0_54 = arith.constant 0 : index
    %196 = vector.load %arg11[%c0_53, %c0_54] : memref<2x32xf32, #tpu.memory_space<vmem>>, vector<2x32xf32>
    tpu.vector_store %arg11[%c0_53, %c0_54], %176 {strides = array<i32>} : memref<2x32xf32, #tpu.memory_space<vmem>>, vector<2x32xf32>,
    %c0_55 = arith.constant 0 : index
    %c0_56 = arith.constant 0 : index
    %197 = vector.load %arg12[%c0_55, %c0_56] : memref<2x32xf32, #tpu.memory_space<vmem>>, vector<2x32xf32>
    tpu.vector_store %arg12[%c0_55, %c0_56], %174 {strides = array<i32>} : memref<2x32xf32, #tpu.memory_space<vmem>>, vector<2x32xf32>,
    return
  }
}

</mosaic_0001>

<bundles_post_ra>
// kernel: tpu_custom_call.1
= control target key start
LH: loop header
LB: loop body
LE: loop exit
PB: predicated region body
PF: predicated region fallthrough
CT: control target
= control target key end

     0   :  { %18 = vsyncpa [#allocation4], 0  ;;  %vm56_vm0 = vcmask 1041408   ;;  %v1262_v2 = vmov 0.0   ;;  %vm1263_vm1 = vmmov 0   ;;  %vm52_vm2 = vcmask 31744   ;;  %s1554_s0 = inlined_call_operand.vmem [shape: f32[16,4], index: 0, kind: input, shape index: {}]   ;;  %s1555_s1 = inlined_call_operand.vmem [shape: f32[2,32], index: 1, kind: input, shape index: {}]   ;;  %s1556_s2 = inlined_call_operand.vmem [shape: f32[2,32], index: 2, kind: input, shape index: {}]   ;;  %s1557_s3 = inlined_call_operand.vmem [shape: bf16[4,32], index: 3, kind: input, shape index: {}]   ;;  %s1558_s4 = inlined_call_operand.vmem [shape: f32[1,32], index: 4, kind: input, shape index: {}]   ;;  %s1559_s5 = inlined_call_operand.vmem [shape: bf16[32,128], index: 5, kind: input, shape index: {}]   ;;  %s1560_s6 = inlined_call_operand.vmem [shape: bf16[32,128], index: 6, kind: input, shape index: {}]   ;;  %s1561_s7 = inlined_call_operand.vmem [shape: f32[1,128], index: 7, kind: input, shape index: {}]   ;;  %s1562_s8 = inlined_call_operand.vmem [shape: bf16[32,4], index: 8, kind: input, shape index: {}]   ;;  %s1563_s9 = inlined_call_operand.vmem [shape: f32[1,4], index: 9, kind: input, shape index: {}]   ;;  %s1564_s10 = inlined_call_operand.vmem [shape: f32[16,4], index: 10, kind: output, shape index: {0}]   ;;  %s1565_s11 = inlined_call_operand.hbm [shape: f32[2,32], index: 11, kind: output, shape index: {1}]   ;;  %s1566_s12 = inlined_call_operand.hbm [shape: f32[2,32], index: 12, kind: output, shape index: {2}]  }
   0x1   :  { %v44_v0 = vld [vmem:[%s1557_s3] sm:$0x3]  ;;  %1047 = vmatprep.subr.bf16.mxu0 %v1262_v2  ;;  %1049 = vmatprep.mubr.msk.bf16.mxu0 %vm1263_vm1, %v1262_v2  ;;  %v42_v4 = vld [vmem:[%s1554_s0 + $0x8] sm:$0xff] }
   0x2   :  { %v41_v1 = vld [vmem:[%s1554_s0] sm:$0xff]  ;;  %v58_v3 = vsel %vm56_vm0, %v44_v0, 0  ;;  %1053 = vmatprep.subr.bf16.mxu1 %v1262_v2  ;;  %1057 = vmatprep.mubr.msk.bf16.mxu1 %vm1263_vm1, %v1262_v2 }
   0x3   :  { %1048 = vmatpush3.bf16.msra.mxu0 %v58_v3  ;;  %v43_v5 = vpack.c.bf16 %v42_v4, %v41_v1 }
   0x4   :  { %1061 = vmatprep.subr.bf16.mxu0 %v1262_v2 }
   0x6   :  { %1050 = vmatmul.mubr.msk.bf16.vlgmr.msra.gmra.mxu0 %vm52_vm2, %v43_v5 }
   0x7   :  { %1065 = vmatprep.mubr.msk.bf16.mxu0 %vm1263_vm1, %v1262_v2 }
   0x8   :  { %19 = vsyncpa [#allocation6], 0  ;;  %v1356_v6 = vld [vmem:[%s1560_s6 + $0x8] sm:$0xff]   ;;  %v1366_v8 = vld [vmem:[%s1560_s6] sm:$0xff]   ;;  %vm127_vm3 = vcmask 261120   ;;  %s1264_s17 = smov 64  }
   0x9   :  { %1062 = vmatpush3.bf16.msra.mxu0 %v1356_v6  ;;  %v1141_v7 = vld [vmem:[%s1559_s5 + $0x8] sm:$0xff]   ;;  %v172_v9 = vld [vmem:[%s1555_s1] sm:$0x3]  ;;  %vm267_vm4 = vcmask 254976   ;;  %vm436_vm5 = vcmask 259076   ;;  %vm351_vm6 = vcmask 257026  }
   0xa   :  { %1063 = vmatprep.subr.bf16.mxu0 %v1262_v2  ;;  %1054 = vmatpush3.bf16.msra.mxu1 %v1141_v7  ;;  %v178_v10 = vpack.c.bf16 %v172_v9, %v172_v9  ;;  %v1143_v11 = vld [vmem:[%s1559_s5] sm:$0xff]   ;;  %vm521_vm7 = vcmask 261126   ;;  %s1266_s24 = smov 96   ;;  %s1268_s26 = smov [#allocation5]  }
   0xb   :  { %1055 = vmatprep.subr.bf16.mxu1 %v1262_v2  ;;  %v987_v12 = vld [vmem:[%s1558_s4] ss:$0 sm:$0xff]  ;;  %s973_s3 = sshll.u32 %s1268_s26, 4  ;;  %s974_s3 = int_to_ptr.vmem [resolvable:$true] %s973_s3 }
   0xc   :  { %v989_v26 = vld [vmem:[%s1561_s7] ss:$0 sm:$0xff]  ;;  %s1265_s7 = smov 32  }
   0xd   :  { %1064 = vmatpush3.bf16.msra.mxu0 %v1366_v8  ;;  %v173_v35 = vld [vmem:[%s1556_s2] sm:$0x3] }
   0xe   :  { %1077 = vmatprep.subr.bf16.mxu0 %v1262_v2  ;;  %1056 = vmatpush3.bf16.msra.mxu1 %v1143_v11 }
   0xf   :  { %1069 = vmatprep.subr.bf16.mxu1 %v1262_v2 }
  0x10   :  { %1066 = vmatmul.mubr.msk.bf16.vlgmr.msra.gmra.mxu0 %vm127_vm3, %v178_v10 }
  0x11   :  { %1078 = vmatpush3.bf16.msra.mxu0 %v1356_v6  ;;  %1081 = vmatprep.mubr.msk.bf16.mxu0 %vm1263_vm1, %v1262_v2 }
  0x12   :  { %1079 = vmatprep.subr.bf16.mxu0 %v1262_v2 }
  0x15   :  { %1080 = vmatpush3.bf16.msra.mxu0 %v1366_v8 }
  0x16   :  { %1093 = vmatprep.subr.bf16.mxu0 %v1262_v2 }
  0xc6   :  { %v94_v13 = vpop.f32.mrf.mxu0 }
  0xc7   :  { %v95_v15 = vadd.f32 %v987_v12, %v94_v13 }
  0xc8   :  { %v1051_v14 = vpop.f32.mrf.mxu0 }
  0xc9   :  { %v101_v19 = vmax.f32 %v95_v15, 0.0 }
  0xca   :  { %v97_v16 = vpop.f32.mrf.mxu0 }
  0xcb   :  { %v98_v17 = vadd.f32 %v987_v12, %v97_v16 }
  0xcc   :  { %v1052_v18 = vpop.f32.mrf.mxu0 }
  0xcd   :  { %v102_v20 = vmax.f32 %v98_v17, 0.0 }
  0xcf   :  { %v103_v21 = vpack.c.bf16 %v102_v20, %v101_v19 }
  0xd0   :  { %v228_v22 = vpop.f32.mrf.mxu0 }
  0xd1   :  { %1058 = vmatmul.mubr.msk.bf16.vlgmr.msra.gmra.mxu1 %vm127_vm3, %v103_v21 }
  0xd2   :  { %1070 = vmatpush3.bf16.msra.mxu1 %v1356_v6  ;;  %1073 = vmatprep.mubr.msk.bf16.mxu1 %vm1263_vm1, %v1262_v2  ;;  %v1067_v23 = vpop.f32.mrf.mxu0 }
  0xd3   :  { %1071 = vmatprep.subr.bf16.mxu1 %v1262_v2 }
  0xd4   :  { %v231_v24 = vpop.f32.mrf.mxu0 }
  0xd6   :  { %1072 = vmatpush3.bf16.msra.mxu1 %v1366_v8  ;;  %v1068_v25 = vpop.f32.mrf.mxu0 }
  0xd7   :  { %1085 = vmatprep.subr.bf16.mxu1 %v1262_v2 }
 0x191   :  { %v165_v27 = vpop.f32.mrf.mxu1 }
 0x192   :  { %v1398_v28 = vadd.f32 %v989_v26, %v165_v27 }
 0x193   :  { %v1059_v29 = vpop.f32.mrf.mxu1 }
 0x194   :  { %v234_v30 = vadd.f32 %v228_v22, %v1398_v28 }
 0x195   :  { %v168_v31 = vpop.f32.mrf.mxu1 }
 0x196   :  { %1146 = vtanh.f32 %v234_v30  ;;  %v1401_v32 = vadd.f32 %v989_v26, %v168_v31  ;;  %v996_v36 = vmul.f32 -1.442695, %v234_v30 }
 0x197   :  { %v1060_v33 = vpop.f32.mrf.mxu1 }
 0x198   :  { %1148 = vpow2.f32 %v996_v36 }
 0x1a3   :  { %v1147_v34 = vpop.eup %1146 }
 0x1a4   :  { %248 = vrot.lane.b32.xlu0 %v1147_v34, %s1264_s17 }
 0x1a5   :  { %v1149_v37 = vpop.eup %1148 }
 0x1a6   :  { %v238_v38 = vadd.f32 1.0, %v1149_v37 }
 0x1a8   :  { %243 = vrot.lane.b32.xlu0 %v173_v35, %s1265_s7  ;;  %1150 = vrcp.f32 %v238_v38 }
 0x1b5   :  { %v1151_v39 = vpop.eup %1150 }
 0x216   :  { %v249_v40 = vpop.permute.xlu0 %248 }
 0x217   :  { %v251_v41 = vmul.f32 %v1151_v39, %v249_v40 }
 0x219   :  { %253 = vrot.lane.b32.xlu1 %v251_v41, %s1265_s7 }
 0x21a   :  { %v244_v42 = vpop.permute.xlu0 %243 }
 0x21b   :  { %v246_v43 = vmul.f32 %v1151_v39, %v244_v42 }
 0x28b   :  { %v254_v44 = vpop.permute.xlu1 %253 }
 0x28c   :  { %v256_v45 = vadd.f32 %v254_v44, %v246_v43 }
 0x28e   :  { %1152 = vtanh.f32 %v256_v45  ;;  %v328_v0 = vrot.slane %v256_v45, 6 }
 0x29b   :  { %v1153_v46 = vpop.eup %1152 }
 0x29c   :  { %259 = vrot.lane.b32.xlu1 %v1153_v46, %s1264_s17 }
 0x30e   :  { %v260_v47 = vpop.permute.xlu1 %259 }
 0x30f   :  { %v1410_v48 = vmul.f32 %v1151_v39, %v260_v47 }
 0x311   :  { %v269_v49 = vpack.c.bf16 %v1410_v48, %v1410_v48 }
 0x313   :  { %271 = vrot.lane.b32.xlu0 %v269_v49, %s1265_s7 }
 0x385   :  { %v272_v50 = vpop.permute.xlu0 %271 }
 0x386   :  { %1074 = vmatmul.mubr.msk.bf16.vlgmr.msra.gmra.mxu1 %vm127_vm3, %v272_v50 }
 0x387   :  { %1086 = vmatpush3.bf16.msra.mxu1 %v1356_v6  ;;  %1089 = vmatprep.mubr.msk.bf16.mxu1 %vm1263_vm1, %v1262_v2 }
 0x388   :  { %1087 = vmatprep.subr.bf16.mxu1 %v1262_v2 }
 0x38b   :  { %1088 = vmatpush3.bf16.msra.mxu1 %v1366_v8 }
 0x38c   :  { %1101 = vmatprep.subr.bf16.mxu1 %v1262_v2 }
 0x446   :  { %v310_v51 = vpop.f32.mrf.mxu1 }
 0x447   :  { %v317_v52 = vrot.slane %v310_v51, 6 }
 0x448   :  { %v1075_v53 = vpop.f32.mrf.mxu1 }
 0x449   :  { %v319_v54 = vadd.f32 %v317_v52, %v1398_v28 }
 0x44a   :  { %v313_v55 = vpop.f32.mrf.mxu1 }
 0x44b   :  { %1154 = vtanh.f32 %v319_v54  ;;  %v998_v58 = vmul.f32 -1.442695, %v319_v54 }
 0x44c   :  { %v1076_v56 = vpop.f32.mrf.mxu1 }
 0x44d   :  { %1156 = vpow2.f32 %v998_v58 }
 0x458   :  { %v1155_v57 = vpop.eup %1154 }
 0x459   :  { %332 = vrot.lane.b32.xlu1 %v1155_v57, %s1264_s17 }
 0x45a   :  { %v1157_v59 = vpop.eup %1156 }
 0x45b   :  { %v323_v60 = vadd.f32 1.0, %v1157_v59 }
 0x45d   :  { %1158 = vrcp.f32 %v323_v60 }
 0x46a   :  { %v1159_v61 = vpop.eup %1158 }
 0x46b   :  { %v330_v1 = vmul.f32 %v1159_v61, %v328_v0 }
 0x4cb   :  { %v333_v62 = vpop.permute.xlu1 %332 }
 0x4cc   :  { %v335_v63 = vmul.f32 %v1159_v61, %v333_v62 }
 0x4ce   :  { %337 = vrot.lane.b32.xlu0 %v335_v63, %s1265_s7 }
 0x540   :  { %v338_v3 = vpop.permute.xlu0 %337 }
 0x541   :  { %v340_v4 = vadd.f32 %v338_v3, %v330_v1 }
 0x543   :  { %1160 = vtanh.f32 %v340_v4  ;;  %v413_v26 = vrot.slane %v340_v4, 6 }
 0x550   :  { %v1161_v5 = vpop.eup %1160 }
 0x551   :  { %343 = vrot.lane.b32.xlu1 %v1161_v5, %s1264_s17 }
 0x5c3   :  { %v344_v7 = vpop.permute.xlu1 %343 }
 0x5c4   :  { %v1426_v9 = vmul.f32 %v1159_v61, %v344_v7 }
 0x5c6   :  { %v353_v10 = vpack.c.bf16 %v1426_v9, %v1426_v9 }
 0x5c8   :  { %v355_v11 = vrot.slane %v353_v10, 1 }
 0x5ca   :  { %356 = vrot.lane.b32.xlu0 %v355_v11, %s1265_s7 }
 0x63c   :  { %v357_v12 = vpop.permute.xlu0 %356 }
 0x63d   :  { %1082 = vmatmul.mubr.msk.bf16.vlgmr.msra.gmra.mxu0 %vm127_vm3, %v357_v12 }
 0x63e   :  { %1094 = vmatpush3.bf16.msra.mxu0 %v1356_v6  ;;  %1097 = vmatprep.mubr.msk.bf16.mxu0 %vm1263_vm1, %v1262_v2 }
 0x63f   :  { %1095 = vmatprep.subr.bf16.mxu0 %v1262_v2 }
 0x642   :  { %1096 = vmatpush3.bf16.msra.mxu0 %v1366_v8 }
 0x643   :  { %1109 = vmatprep.subr.bf16.mxu0 %v1262_v2 }
 0x6fd   :  { %v395_v13 = vpop.f32.mrf.mxu0 }
 0x6fe   :  { %v402_v14 = vrot.slane %v395_v13, 4 }
 0x6ff   :  { %v1083_v15 = vpop.f32.mrf.mxu0 }
 0x700   :  { %v404_v16 = vadd.f32 %v402_v14, %v1398_v28 }
 0x701   :  { %v398_v17 = vpop.f32.mrf.mxu0 }
 0x702   :  { %1162 = vtanh.f32 %v404_v16  ;;  %v1000_v20 = vmul.f32 -1.442695, %v404_v16 }
 0x703   :  { %v1084_v18 = vpop.f32.mrf.mxu0 }
 0x704   :  { %1164 = vpow2.f32 %v1000_v20 }
 0x70f   :  { %v1163_v19 = vpop.eup %1162 }
 0x710   :  { %417 = vrot.lane.b32.xlu1 %v1163_v19, %s1264_s17 }
 0x711   :  { %v1165_v21 = vpop.eup %1164 }
 0x712   :  { %v408_v22 = vadd.f32 1.0, %v1165_v21 }
 0x714   :  { %1166 = vrcp.f32 %v408_v22 }
 0x721   :  { %v1167_v23 = vpop.eup %1166 }
 0x722   :  { %v415_v27 = vmul.f32 %v1167_v23, %v413_v26 }
 0x782   :  { %v418_v24 = vpop.permute.xlu1 %417 }
 0x783   :  { %v420_v25 = vmul.f32 %v1167_v23, %v418_v24 }
 0x785   :  { %422 = vrot.lane.b32.xlu0 %v420_v25, %s1265_s7 }
 0x7f7   :  { %v423_v29 = vpop.permute.xlu0 %422 }
 0x7f8   :  { %v425_v30 = vadd.f32 %v423_v29, %v415_v27 }
 0x7fa   :  { %1168 = vtanh.f32 %v425_v30  ;;  %v498_v52 = vrot.slane %v425_v30, 6 }
 0x807   :  { %v1169_v31 = vpop.eup %1168 }
 0x808   :  { %428 = vrot.lane.b32.xlu1 %v1169_v31, %s1264_s17 }
 0x87a   :  { %v429_v33 = vpop.permute.xlu1 %428 }
 0x87b   :  { %v1442_v34 = vmul.f32 %v1167_v23, %v429_v33 }
 0x87d   :  { %v438_v35 = vpack.c.bf16 %v1442_v34, %v1442_v34 }
 0x87f   :  { %v440_v36 = vrot.slane %v438_v35, 2 }
 0x881   :  { %441 = vrot.lane.b32.xlu0 %v440_v36, %s1265_s7 }
 0x8f3   :  { %v442_v37 = vpop.permute.xlu0 %441 }
 0x8f4   :  { %1090 = vmatmul.mubr.msk.bf16.vlgmr.msra.gmra.mxu1 %vm127_vm3, %v442_v37 }
 0x8f5   :  { %1102 = vmatpush3.bf16.msra.mxu1 %v1356_v6  ;;  %1105 = vmatprep.mubr.msk.bf16.mxu1 %vm1263_vm1, %v1262_v2 }
 0x8f6   :  { %1103 = vmatprep.subr.bf16.mxu1 %v1262_v2 }
 0x8f9   :  { %1104 = vmatpush3.bf16.msra.mxu1 %v1366_v8 }
 0x8fa   :  { %1117 = vmatprep.subr.bf16.mxu1 %v1262_v2 }
 0x9b4   :  { %v480_v38 = vpop.f32.mrf.mxu1 }
 0x9b5   :  { %v487_v39 = vrot.slane %v480_v38, 2 }
 0x9b6   :  { %v1091_v40 = vpop.f32.mrf.mxu1 }
 0x9b7   :  { %v489_v41 = vadd.f32 %v487_v39, %v1398_v28 }
 0x9b8   :  { %v483_v42 = vpop.f32.mrf.mxu1 }
 0x9b9   :  { %1170 = vtanh.f32 %v489_v41  ;;  %v1002_v45 = vmul.f32 -1.442695, %v489_v41 }
 0x9ba   :  { %v1092_v43 = vpop.f32.mrf.mxu1 }
 0x9bb   :  { %1172 = vpow2.f32 %v1002_v45 }
 0x9c6   :  { %v1171_v44 = vpop.eup %1170 }
 0x9c7   :  { %502 = vrot.lane.b32.xlu1 %v1171_v44, %s1264_s17 }
 0x9c8   :  { %v1173_v46 = vpop.eup %1172 }
 0x9c9   :  { %v493_v47 = vadd.f32 1.0, %v1173_v46 }
 0x9cb   :  { %1174 = vrcp.f32 %v493_v47 }
 0x9d8   :  { %v1175_v49 = vpop.eup %1174 }
 0x9d9   :  { %v500_v53 = vmul.f32 %v1175_v49, %v498_v52 }
 0xa39   :  { %v503_v50 = vpop.permute.xlu1 %502 }
 0xa3a   :  { %v505_v51 = vmul.f32 %v1175_v49, %v503_v50 }
 0xa3c   :  { %507 = vrot.lane.b32.xlu0 %v505_v51, %s1265_s7 }
 0xaae   :  { %v508_v54 = vpop.permute.xlu0 %507 }
 0xaaf   :  { %v510_v28 = vadd.f32 %v508_v54, %v500_v53 }
 0xab1   :  { %1176 = vtanh.f32 %v510_v28  ;;  %v580_v13 = vrot.slane %v510_v28, 6 }
 0xabe   :  { %v1177_v55 = vpop.eup %1176 }
 0xabf   :  { %513 = vrot.lane.b32.xlu1 %v1177_v55, %s1264_s17 }
 0xb31   :  { %v514_v56 = vpop.permute.xlu1 %513 }
 0xb32   :  { %v1458_v57 = vmul.f32 %v1175_v49, %v514_v56 }
 0xb34   :  { %v523_v58 = vpack.c.bf16 %v1458_v57, %v1458_v57 }
 0xb36   :  { %v525_v59 = vrot.slane %v523_v58, 3 }
 0xb38   :  { %526 = vrot.lane.b32.xlu0 %v525_v59, %s1265_s7 }
 0xbaa   :  { %v527_v60 = vpop.permute.xlu0 %526 }
 0xbab   :  { %1098 = vmatmul.mubr.msk.bf16.vlgmr.msra.gmra.mxu0 %vm127_vm3, %v527_v60 }
 0xbac   :  { %1110 = vmatpush3.bf16.msra.mxu0 %v1356_v6  ;;  %1113 = vmatprep.mubr.msk.bf16.mxu0 %vm1263_vm1, %v1262_v2 }
 0xbad   :  { %1111 = vmatprep.subr.bf16.mxu0 %v1262_v2 }
 0xbb0   :  { %1112 = vmatpush3.bf16.msra.mxu0 %v1366_v8 }
 0xbb1   :  { %1125 = vmatprep.subr.bf16.mxu0 %v1262_v2 }
 0xc6b   :  { %v565_v61 = vpop.f32.mrf.mxu0 }
 0xc6c   :  { %v571_v62 = vadd.f32 %v565_v61, %v1401_v32 }
 0xc6d   :  { %v1099_v63 = vpop.f32.mrf.mxu0 }
 0xc6e   :  { %1178 = vtanh.f32 %v571_v62  ;;  %v1004_v4 = vmul.f32 -1.442695, %v571_v62 }
 0xc6f   :  { %v568_v0 = vpop.f32.mrf.mxu0 }
 0xc70   :  { %1180 = vpow2.f32 %v1004_v4 }
 0xc71   :  { %v1100_v1 = vpop.f32.mrf.mxu0 }
 0xc7b   :  { %v1179_v3 = vpop.eup %1178 }
 0xc7c   :  { %584 = vrot.lane.b32.xlu1 %v1179_v3, %s1264_s17 }
 0xc7d   :  { %v1181_v5 = vpop.eup %1180 }
 0xc7e   :  { %v575_v7 = vadd.f32 1.0, %v1181_v5 }
 0xc80   :  { %1182 = vrcp.f32 %v575_v7 }
 0xc8d   :  { %v1183_v10 = vpop.eup %1182 }
 0xc8e   :  { %v582_v14 = vmul.f32 %v1183_v10, %v580_v13 }
 0xcee   :  { %v585_v11 = vpop.permute.xlu1 %584 }
 0xcef   :  { %v587_v12 = vmul.f32 %v1183_v10, %v585_v11 }
 0xcf1   :  { %589 = vrot.lane.b32.xlu0 %v587_v12, %s1265_s7 }
 0xd63   :  { %v590_v15 = vpop.permute.xlu0 %589 }
 0xd64   :  { %v592_v16 = vadd.f32 %v590_v15, %v582_v14 }
 0xd66   :  { %1184 = vtanh.f32 %v592_v16 }
 0xd73   :  { %v1185_v17 = vpop.eup %1184 }
 0xd74   :  { %595 = vrot.lane.b32.xlu1 %v1185_v17, %s1264_s17 }
 0xde6   :  { %v596_v18 = vpop.permute.xlu1 %595 }
 0xde7   :  { %v1474_v19 = vmul.f32 %v1183_v10, %v596_v18 }
 0xde9   :  { %v604_v20 = vpack.c.bf16 %v1474_v19, %v1474_v19 }
 0xdeb   :  { %606 = vrot.lane.b32.xlu0 %v604_v20, %s1265_s7 }
 0xe5d   :  { %v607_v21 = vpop.permute.xlu0 %606 }
 0xe5e   :  { %1106 = vmatmul.mubr.msk.bf16.vlgmr.msra.gmra.mxu1 %vm127_vm3, %v607_v21 }
 0xe5f   :  { %1118 = vmatpush3.bf16.msra.mxu1 %v1356_v6  ;;  %1121 = vmatprep.mubr.msk.bf16.mxu1 %vm1263_vm1, %v1262_v2 }
 0xe60   :  { %1119 = vmatprep.subr.bf16.mxu1 %v1262_v2 }
 0xe63   :  { %1120 = vmatpush3.bf16.msra.mxu1 %v1366_v8  ;;  %v663_v8 = vrot.slane %v592_v16, 6 }
 0xf1e   :  { %v645_v22 = vpop.f32.mrf.mxu1 }
 0xf1f   :  { %v652_v23 = vrot.slane %v645_v22, 6 }
 0xf20   :  { %v1107_v24 = vpop.f32.mrf.mxu1 }
 0xf21   :  { %v654_v25 = vadd.f32 %v652_v23, %v1401_v32 }
 0xf22   :  { %v648_v26 = vpop.f32.mrf.mxu1 }
 0xf23   :  { %1186 = vtanh.f32 %v654_v25  ;;  %v1006_v30 = vmul.f32 -1.442695, %v654_v25 }
 0xf24   :  { %v1108_v27 = vpop.f32.mrf.mxu1 }
 0xf25   :  { %1188 = vpow2.f32 %v1006_v30 }
 0xf30   :  { %v1187_v29 = vpop.eup %1186 }
 0xf31   :  { %667 = vrot.lane.b32.xlu1 %v1187_v29, %s1264_s17 }
 0xf32   :  { %v1189_v6 = vpop.eup %1188 }
 0xf33   :  { %v658_v31 = vadd.f32 1.0, %v1189_v6  ;;  %v1145_v6 = vld [vmem:[%s1562_s8] sm:$0xff]  }
 0xf35   :  { %1190 = vrcp.f32 %v658_v31 }
 0xf42   :  { %v1191_v33 = vpop.eup %1190 }
 0xf43   :  { %v665_v37 = vmul.f32 %v1191_v33, %v663_v8 }
 0xfa3   :  { %v668_v35 = vpop.permute.xlu1 %667 }
 0xfa4   :  { %v670_v36 = vmul.f32 %v1191_v33, %v668_v35 }
 0xfa6   :  { %672 = vrot.lane.b32.xlu0 %v670_v36, %s1265_s7 }
0x1018   :  { %v673_v38 = vpop.permute.xlu0 %672 }
0x1019   :  { %v675_v39 = vadd.f32 %v673_v38, %v665_v37  ;;  %v1011_v38 = vld [vmem:[%s1563_s9] ss:$0 sm:$0xff]  ;;  %s1267_s9 = smov [#allocation3]  }
0x101a   :  { %s963_s25 = sshll.u32 %s1267_s9, 4  ;;  %s964_s25 = int_to_ptr.vmem [resolvable:$true] %s963_s25 }
0x101b   :  { %1192 = vtanh.f32 %v675_v39  ;;  %v747_v60 = vrot.slane %v675_v39, 6  ;;  %s1218_s27 = scalar_lea.vmem %s964_s25, 32  ;;  %p1223_p1 = scmp.lt.s32.totalorder %s964_s25, %s964_s25 }
0x101c   :  { %p1219_p0 = scmp.ne.s32.totalorder %s964_s25, %s1218_s27  ;;  %p1224_p2 = scmp.lt.s32.totalorder %s1218_s27, %s1218_s27 }
0x101e   :  { %p1225_p3 = por %p1224_p2, %p1223_p1 }
0x1020   :  { %p1226_p4 = pnand %p1225_p3, %p1219_p0 }
0x1028   :  { %v1193_v40 = vpop.eup %1192 }
0x1029   :  { %678 = vrot.lane.b32.xlu1 %v1193_v40, %s1264_s17 }
0x109b   :  { %v679_v41 = vpop.permute.xlu1 %678 }
0x109c   :  { %v1489_v42 = vmul.f32 %v1191_v33, %v679_v41 }
0x109e   :  { %v687_v43 = vpack.c.bf16 %v1489_v42, %v1489_v42 }
0x10a0   :  { %v689_v44 = vrot.slane %v687_v43, 1 }
0x10a2   :  { %690 = vrot.lane.b32.xlu0 %v689_v44, %s1265_s7 }
0x1114   :  { %v691_v45 = vpop.permute.xlu0 %690 }
0x1115   :  { %1114 = vmatmul.mubr.msk.bf16.vlgmr.msra.gmra.mxu0 %vm127_vm3, %v691_v45 }
0x1116   :  { %1129 = vmatprep.mubr.msk.bf16.mxu0 %vm1263_vm1, %v1262_v2 }
0x11d5   :  { %v729_v46 = vpop.f32.mrf.mxu0 }
0x11d6   :  { %v736_v47 = vrot.slane %v729_v46, 4 }
0x11d7   :  { %v1115_v49 = vpop.f32.mrf.mxu0 }
0x11d8   :  { %v738_v50 = vadd.f32 %v736_v47, %v1401_v32 }
0x11d9   :  { %v732_v51 = vpop.f32.mrf.mxu0 }
0x11da   :  { %1194 = vtanh.f32 %v738_v50  ;;  %v1008_v54 = vmul.f32 -1.442695, %v738_v50 }
0x11db   :  { %v1116_v52 = vpop.f32.mrf.mxu0 }
0x11dc   :  { %1196 = vpow2.f32 %v1008_v54 }
0x11e7   :  { %v1195_v53 = vpop.eup %1194 }
0x11e8   :  { %751 = vrot.lane.b32.xlu1 %v1195_v53, %s1264_s17 }
0x11e9   :  { %v1197_v28 = vpop.eup %1196 }
0x11ea   :  { %v742_v55 = vadd.f32 1.0, %v1197_v28 }
0x11ec   :  { %1198 = vrcp.f32 %v742_v55 }
0x11f9   :  { %v1199_v56 = vpop.eup %1198 }
0x11fa   :  { %v749_v61 = vmul.f32 %v1199_v56, %v747_v60 }
0x125a   :  { %v752_v58 = vpop.permute.xlu1 %751 }
0x125b   :  { %v754_v59 = vmul.f32 %v1199_v56, %v752_v58 }
0x125d   :  { %756 = vrot.lane.b32.xlu0 %v754_v59, %s1265_s7 }
0x12cf   :  { %v757_v62 = vpop.permute.xlu0 %756 }
0x12d0   :  { %v759_v63 = vadd.f32 %v757_v62, %v749_v61 }
0x12d2   :  { %1200 = vtanh.f32 %v759_v63 }
0x12df   :  { %v1201_v0 = vpop.eup %1200 }
0x12e0   :  { %762 = vrot.lane.b32.xlu1 %v1201_v0, %s1264_s17 }
0x1352   :  { %v763_v1 = vpop.permute.xlu1 %762 }
0x1353   :  { %v765_v3 = vmul.f32 %v1199_v56, %v763_v1 }
0x1355   :  { %v771_v4 = vpack.c.bf16 %v765_v3, %v765_v3 }
0x1357   :  { %v773_v5 = vrot.slane %v771_v4, 2 }
0x1359   :  { %774 = vrot.lane.b32.xlu0 %v773_v5, %s1265_s7 }
0x13cb   :  { %v775_v7 = vpop.permute.xlu0 %774 }
0x13cc   :  { %1122 = vmatmul.mubr.msk.bf16.vlgmr.msra.gmra.mxu1 %vm127_vm3, %v775_v7 }
0x148c   :  { %v813_v10 = vpop.f32.mrf.mxu1 }
0x148d   :  { %v820_v11 = vrot.slane %v813_v10, 2 }
0x148e   :  { %v1123_v12 = vpop.f32.mrf.mxu1 }
0x148f   :  { %v822_v13 = vadd.f32 %v820_v11, %v1401_v32  ;;  %v831_v32 = vrot.slane %v759_v63, 6 }
0x1490   :  { %v816_v14 = vpop.f32.mrf.mxu1 }
0x1491   :  { %1202 = vtanh.f32 %v822_v13  ;;  %v1010_v17 = vmul.f32 -1.442695, %v822_v13 }
0x1492   :  { %v1124_v15 = vpop.f32.mrf.mxu1 }
0x1493   :  { %1204 = vpow2.f32 %v1010_v17 }
0x149e   :  { %v1203_v16 = vpop.eup %1202 }
0x149f   :  { %835 = vrot.lane.b32.xlu1 %v1203_v16, %s1264_s17 }
0x14a0   :  { %v1205_v18 = vpop.eup %1204 }
0x14a1   :  { %v826_v20 = vadd.f32 1.0, %v1205_v18 }
0x14a3   :  { %1206 = vrcp.f32 %v826_v20 }
0x14b0   :  { %v1207_v21 = vpop.eup %1206 }
0x14b1   :  { %v833_v24 = vmul.f32 %v1207_v21, %v831_v32 }
0x1511   :  { %v836_v22 = vpop.permute.xlu1 %835 }
0x1512   :  { %v838_v23 = vmul.f32 %v1207_v21, %v836_v22 }
0x1514   :  { %840 = vrot.lane.b32.xlu0 %v838_v23, %s1265_s7 }
0x1518   :  { %264 = vrot.lane.b32.xlu0 %v1410_v48, %s1265_s7 }
0x151c   :  { %433 = vrot.lane.b32.xlu0 %v1442_v34, %s1265_s7 }
0x1520   :  { %600 = vrot.lane.b32.xlu0 %v1474_v19, %s1265_s7  ;;  %v1144_v19 = vld [vmem:[%s1562_s8 + $0x8] sm:$0xff]  }
0x1521   :  { %1126 = vmatpush3.bf16.msra.mxu0 %v1144_v19 }
0x1522   :  { %1127 = vmatprep.subr.bf16.mxu0 %v1262_v2 }
0x1524   :  { %767 = vrot.lane.b32.xlu0 %v765_v3, %s1265_s7 }
0x1525   :  { %1128 = vmatpush3.bf16.msra.mxu0 %v1145_v6 }
0x1586   :  { %v841_v25 = vpop.permute.xlu0 %840 }
0x1587   :  { %v843_v26 = vadd.f32 %v841_v25, %v833_v24 }
0x1589   :  { %1208 = vtanh.f32 %v843_v26 }
0x158a   :  { %v265_v27 = vpop.permute.xlu0 %264 }
0x158b   :  { %268 = vst.msk [vmem:[#allocation2] sm:$0x3] %vm267_vm4, %v265_v27 }
0x158e   :  { %v434_v29 = vpop.permute.xlu0 %433 }
0x158f   :  { %437 = vst.msk [vmem:[#allocation2] sm:$0x30] %vm436_vm5, %v434_v29 }
0x1592   :  { %v601_v48 = vpop.permute.xlu0 %600 }
0x1593   :  { %603 = vst.msk [vmem:[#allocation2 + $0x8] sm:$0x3] %vm267_vm4, %v601_v48 }
0x1596   :  { %v1209_v30 = vpop.eup %1208  ;;  %v768_v34 = vpop.permute.xlu0 %767 }
0x1597   :  { %770 = vst.msk [vmem:[#allocation2 + $0x8] sm:$0x30] %vm436_vm5, %v768_v34  ;;  %846 = vrot.lane.b32.xlu1 %v1209_v30, %s1264_s17 }
0x159b   :  { %348 = vrot.lane.b32.xlu1 %v1426_v9, %s1265_s7 }
0x159f   :  { %518 = vrot.lane.b32.xlu1 %v1458_v57, %s1265_s7 }
0x15a3   :  { %683 = vrot.lane.b32.xlu1 %v1489_v42, %s1265_s7 }
0x1609   :  { %v847_v31 = vpop.permute.xlu1 %846 }
0x160a   :  { %v849_v9 = vmul.f32 %v1207_v21, %v847_v31 }
0x160c   :  { %851 = vrot.lane.b32.xlu1 %v849_v9, %s1265_s7 }
0x160d   :  { %v349_v57 = vpop.permute.xlu1 %348 }
0x160e   :  { %352 = vst.msk [vmem:[#allocation2] sm:$0xc] %vm351_vm6, %v349_v57 }
0x1611   :  { %v519_v33 = vpop.permute.xlu1 %518 }
0x1612   :  { %522 = vst.msk [vmem:[#allocation2] sm:$0xc0] %vm521_vm7, %v519_v33 }
0x1615   :  { %v684_v35 = vpop.permute.xlu1 %683 }
0x1616   :  { %686 = vst.msk [vmem:[#allocation2 + $0x8] sm:$0xc] %vm351_vm6, %v684_v35 }
0x1619   :  { %v855_v2 = vld [vmem:[#allocation2] sm:$0xff] }
0x167e   :  { %v852_v36 = vpop.permute.xlu1 %851 }
0x167f   :  { %854 = vst.msk [vmem:[#allocation2 + $0x8] sm:$0xc0] %vm521_vm7, %v852_v36  ;;  %949 = vst.msk [vmem:[#allocation3 - $0x6] sm:$0xc0] %vm521_vm7, %v852_v36 }
0x1686   :  { %v856_v8 = vld [vmem:[#allocation2 + $0x8] sm:$0xff] }
0x1687   :  { %v857_v37 = vpack.c.bf16 %v856_v8, %v855_v2 }
0x1689   :  { %1130 = vmatmul.mubr.msk.bf16.vlgmr.msra.gmra.mxu0 %vm127_vm3, %v857_v37 }
0x1749   :  { %v918_v39 = vpop.f32.mrf.mxu0 }
0x174a   :  { %v919_v40 = vadd.f32 %v1011_v38, %v918_v39 }
0x174b   :  { %v1131_v41 = vpop.f32.mrf.mxu0 }
0x174c   :  { %v925_v42 = vsel %vm52_vm2, %v919_v40, -inf }
0x174d   :  { %926 = vmax.xlane.f32.xlu0 %v925_v42  ;;  %v921_v43 = vpop.f32.mrf.mxu0 }
0x174e   :  { %v922_v44 = vadd.f32 %v1011_v38, %v921_v43 }
0x174f   :  { %v1132_v45 = vpop.f32.mrf.mxu0 }
0x1750   :  { %v928_v46 = vsel %vm52_vm2, %v922_v44, -inf }
0x1751   :  { %929 = vmax.xlane.f32.xlu1 %v928_v46 }
0x1762   :  { %951 = vrot.lane.b32.xlu1 %v843_v26, %s1266_s24 }
0x17d6   :  { %v927_v47 = vpop.xlane.xlu0 %926 }
0x17d7   :  { %v931_v49 = vsub.f32 %v919_v40, %v927_v47 }
0x17d9   :  { %v933_v50 = vmul.f32 1.442695, %v931_v49 }
0x17da   :  { %v930_v51 = vpop.xlane.xlu1 %929 }
0x17db   :  { %1210 = vpow2.f32 %v933_v50  ;;  %v932_v52 = vsub.f32 %v922_v44, %v930_v51 }
0x17dd   :  { %v935_v53 = vmul.f32 1.442695, %v932_v52 }
0x17de   :  { %v952_v54 = vpop.permute.xlu1 %951 }
0x17df   :  { %1212 = vpow2.f32 %v935_v53  ;;  %954 = vst.msk [vmem:[#allocation5 - $0x6] sm:$0xc0] %vm521_vm7, %v952_v54 }
0x17e8   :  { %v1211_v28 = vpop.eup %1210 }
0x17e9   :  { %v937_v55 = vsel %vm52_vm2, %v1211_v28, 0.0 }
0x17ea   :  { %938 = vadd.xlane.f32.xlu0 %v937_v55 }
0x17ec   :  { %v1213_v56 = vpop.eup %1212 }
0x17ed   :  { %v940_v58 = vsel %vm52_vm2, %v1213_v56, 0.0 }
0x17ee   :  { %941 = vadd.xlane.f32.xlu0 %v940_v58 }
0x17ef   :  { %1229 = shalt.err (!%p1226_p4)
}
0x17f0   :  { %966 = dma.vmem_to_hbm [thread:$0]  %s964_s25, 32, %s1565_s11, [#allocation4]  }
0x17f1   :  { %s1238_s29 = scalar_lea.vmem %s974_s3, 32  ;;  %p1243_p6 = scmp.lt.s32.totalorder %s974_s3, %s974_s3 }
0x17f2   :  { %p1239_p5 = scmp.ne.s32.totalorder %s974_s3, %s1238_s29  ;;  %p1244_p7 = scmp.lt.s32.totalorder %s1238_s29, %s1238_s29 }
0x17f4   :  { %p1245_p8 = por %p1244_p7, %p1243_p6 }
0x17f6   :  { %p1246_p9 = pnand %p1245_p8, %p1239_p5 }
0x17f8   :  { %1249 = shalt.err (!%p1246_p9)
}
0x17f9   :  { %976 = dma.vmem_to_hbm [thread:$0]  %s974_s3, 32, %s1566_s12, [#allocation6]  }
0x1873   :  { %v939_v59 = vpop.xlane.xlu0 %938 }
0x1874   :  { %1214 = vrcp.f32 %v939_v59 }
0x1877   :  { %v942_v60 = vpop.xlane.xlu0 %941 }
0x1878   :  { %1216 = vrcp.f32 %v942_v60 }
0x1881   :  { %v1215_v61 = vpop.eup %1214 }
0x1882   :  { %v945_v62 = vmul.f32 %v1215_v61, %v1211_v28 }
0x1884   :  { %947 = vst.msk [vmem:[%s1564_s10] sm:$0xff] %vm52_vm2, %v945_v62 }
0x1885   :  { %v1217_v63 = vpop.eup %1216 }
0x1886   :  { %v946_v0 = vmul.f32 %v1217_v63, %v1213_v56 }
0x1888   :  { %948 = vst.msk [vmem:[%s1564_s10 + $0x8] sm:$0xff] %vm52_vm2, %v946_v0 }
0x1889   :  { %1258 = dma.done.wait [#allocation4], 32  }
0x188a   :  { %1259 = vsyncadd [#allocation4], 4294967264 }
0x188b   :  { %1260 = dma.done.wait [#allocation6], 32  }
0x188c   :  { %1261 = vsyncadd [#allocation6], 4294967264 }
0x188d   :  { %985 = vsyncpa [#allocation4], 1 }
0x188e   :  { %986 = vsyncpa [#allocation6], 1 }

</bundles_post_ra>
